<compile_context>
chip_gen: v7x
topology: tpu7x:2x2x1
jax: 0.10.0
libtpu: 0.0.40
codegen_flags: <defaults>
</compile_context>

<pallas_src>
import jax
import jax.numpy as jnp
from jax.experimental import pallas as pl
from jax.experimental.pallas import tpu as pltpu


def _round_up(v, m):
    return ((v + m - 1) // m) * m


def gnnstack_kernel(adj_ref, xk_ref, xi_ref, wl_ref, wr_ref, w12_ref, b12_ref,
                    out_ref, acc_ref):
    """One (row-tile i, k-tile) grid step.

    adj_ref: [TM, TK] bf16  normalized adjacency block (row i-tile, col k-tile)
    xk_ref:  [TK, Fp] bf16  node features for the k-tile (feeds x @ Wr)
    xi_ref:  [TM, Fp] bf16  node features for the i-tile (feeds x @ Wl; resident across k)
    wl_ref:  [Fp, Hp] bf16  lin_l weight (pre-transposed, padded)
    wr_ref:  [Fp, Hp] bf16  lin_r weight (pre-transposed, padded)
    w12_ref: [Hp, Cp] f32   fused post_mp weight
    b12_ref: [1,  Cp] f32   fused post_mp bias (-1e30 in padded class columns)
    out_ref: [TM, Cp] f32   log-softmax output block
    acc_ref: [TM, Hp] f32   VMEM accumulator for A_norm @ (x @ Wr)
    """
    k = pl.program_id(1)

    @pl.when(k == 0)
    def _():
        acc_ref[...] = jnp.zeros_like(acc_ref)

    # project the k-tile features (bf16 MXU inputs, f32 accumulation), then aggregate.
    xr = jnp.dot(xk_ref[...], wr_ref[...],
                 preferred_element_type=jnp.float32).astype(jnp.bfloat16)
    acc_ref[...] += jnp.dot(adj_ref[...], xr, preferred_element_type=jnp.float32)

    @pl.when(k == pl.num_programs(1) - 1)
    def _():
        # lin_l(x) + lin_r(agg)   (xi block is identical across k -> stays resident in VMEM)
        xl = jnp.dot(xi_ref[...], wl_ref[...], preferred_element_type=jnp.float32)
        h = xl + acc_ref[...]

        # F.normalize (per-row L2, eps=1e-12) via rsqrt (EUP slot, no VPU divide)
        ssq = jnp.sum(h * h, axis=-1, keepdims=True)
        h = h * jax.lax.rsqrt(jnp.maximum(ssq, 1e-24))

        # ReLU; dropout = identity in eval mode
        h = jnp.maximum(h, 0.0)

        # fused post_mp: single matmul + bias
        y = jnp.dot(h, w12_ref[...], preferred_element_type=jnp.float32) + b12_ref[...]

        # log_softmax over class axis (padded classes carry -1e30 bias -> exp underflows to 0)
        m = jnp.max(y, axis=-1, keepdims=True)
        s = y - m
        lse = jnp.log(jnp.sum(jnp.exp(s), axis=-1, keepdims=True))
        out_ref[...] = s - lse


@jax.jit
def gnnstack_forward(x, edge_index, params):
    """Build padded/prepped operands and run the tiled kernel."""
    n, fin = x.shape
    h_dim = params["wl"].shape[0]
    c_dim = params["w2"].shape[0]

    # --- fuse post_mp linears (exact in eval mode) ---
    w1_t = params["w1"].T                      # [H, H]
    w2_t = params["w2"].T                      # [H, C]
    w12 = jnp.dot(w1_t, w2_t)                  # [H, C]
    b12 = jnp.dot(params["b1"].reshape(1, -1), w2_t) + params["b2"].reshape(1, -1)

    # --- lane/MXU-friendly padding and tile sizing ---
    npad = _round_up(max(n, 8), 128)
    tile = min(256, npad)                      # TM = TK; per-step VMEM stays small
    npad = _round_up(npad, tile)
    fp = _round_up(fin, 128)
    hp = _round_up(h_dim, 128)
    cp = _round_up(c_dim, 128)

    # dense normalized adjacency built directly at padded size
    # (row i = mean weights of in-edges of i; isolated / padded rows stay zero)
    src, dst = edge_index[0], edge_index[1]
    adj = jnp.zeros((npad, npad), jnp.float32).at[dst, src].add(1.0)
    deg = jnp.sum(adj, axis=1, keepdims=True)
    adj = (adj / jnp.maximum(deg, 1.0)).astype(jnp.bfloat16)

    xp = jnp.zeros((npad, fp), jnp.bfloat16).at[:n, :fin].set(x.astype(jnp.bfloat16))
    wl = jnp.zeros((fp, hp), jnp.bfloat16).at[:fin, :h_dim].set(
        params["wl"].T.astype(jnp.bfloat16))
    wr = jnp.zeros((fp, hp), jnp.bfloat16).at[:fin, :h_dim].set(
        params["wr"].T.astype(jnp.bfloat16))
    w12p = jnp.zeros((hp, cp), jnp.float32).at[:h_dim, :c_dim].set(w12)
    NEG = jnp.float32(-1e30)
    b12p = jnp.full((1, cp), NEG, jnp.float32).at[0, :c_dim].set(b12[0])

    grid = (npad // tile, npad // tile)

    out = pl.pallas_call(
        gnnstack_kernel,
        out_shape=jax.ShapeDtypeStruct((npad, cp), jnp.float32),
        grid_spec=pltpu.PrefetchScalarGridSpec(
            num_scalar_prefetch=0,
            grid=grid,
            in_specs=[
                pl.BlockSpec((tile, tile), lambda i, k: (i, k)),   # adj block
                pl.BlockSpec((tile, fp), lambda i, k: (k, 0)),     # x (k rows) -> x @ Wr
                pl.BlockSpec((tile, fp), lambda i, k: (i, 0)),     # x (i rows) -> x @ Wl
                pl.BlockSpec((fp, hp), lambda i, k: (0, 0)),       # Wl^T (padded)
                pl.BlockSpec((fp, hp), lambda i, k: (0, 0)),       # Wr^T (padded)
                pl.BlockSpec((hp, cp), lambda i, k: (0, 0)),       # fused post_mp weight
                pl.BlockSpec((1, cp), lambda i, k: (0, 0)),        # fused post_mp bias
            ],
            out_specs=pl.BlockSpec((tile, cp), lambda i, k: (i, 0)),
            scratch_shapes=[pltpu.VMEM((tile, hp), jnp.float32)],
        ),
        compiler_params=pltpu.CompilerParams(
            dimension_semantics=("parallel", "arbitrary")),
    )(adj, xp, xp, wl, wr, w12p, b12p)

    return out[:n, :c_dim]


def reference_forward(x, edge_index, params):
    """Pure-JAX f32 reference of the PyTorch forward (eval mode)."""
    n = x.shape[0]
    src, dst = edge_index[0], edge_index[1]
    agg = jnp.zeros((n, x.shape[1]), jnp.float32).at[dst].add(x[src])
    cnt = jnp.zeros((n, 1), jnp.float32).at[dst].add(1.0)
    agg = agg / jnp.maximum(cnt, 1.0)                       # scatter-mean
    h = x @ params["wl"].T + agg @ params["wr"].T
    norm = jnp.sqrt(jnp.sum(h * h, axis=-1, keepdims=True))
    h = h / jnp.maximum(norm, 1e-12)                        # F.normalize
    h = jnp.maximum(h, 0.0)                                 # ReLU (dropout = identity)
    y = h @ params["w1"].T + params["b1"]
    y = y @ params["w2"].T + params["b2"]
    return jax.nn.log_softmax(y, axis=-1)


def init_params(key, input_dim, hidden_dim, output_dim):
    """PyTorch-Linear-style init (uniform(-1/sqrt(fan_in), 1/sqrt(fan_in)))."""
    ks = jax.random.split(key, 6)

    def lin_w(k, fan_out, fan_in):
        bound = 1.0 / (fan_in ** 0.5)
        return jax.random.uniform(k, (fan_out, fan_in), jnp.float32, -bound, bound)

    def lin_b(k, fan_out, fan_in):
        bound = 1.0 / (fan_in ** 0.5)
        return jax.random.uniform(k, (fan_out,), jnp.float32, -bound, bound)

    return {
        "wl": lin_w(ks[0], hidden_dim, input_dim),    # GraphSage.lin_l (bias=False)
        "wr": lin_w(ks[1], hidden_dim, input_dim),    # GraphSage.lin_r (bias=False)
        "w1": lin_w(ks[2], hidden_dim, hidden_dim),   # post_mp Linear 1
        "b1": lin_b(ks[3], hidden_dim, hidden_dim),
        "w2": lin_w(ks[4], output_dim, hidden_dim),   # post_mp Linear 2
        "b2": lin_b(ks[5], output_dim, hidden_dim),
    }


if __name__ == "__main__":
    N = 8            # number of graph nodes
    E = 24           # number of edges
    INPUT_DIM = 16
    HIDDEN_DIM = 32
    OUTPUT_DIM = 8

    key = jax.random.PRNGKey(0)
    kx, ke, kp = jax.random.split(key, 3)

    x = jax.random.normal(kx, (N, INPUT_DIM), jnp.float32)
    edge_index = jax.random.randint(ke, (2, E), 0, N, jnp.int32)
    params = init_params(kp, INPUT_DIM, HIDDEN_DIM, OUTPUT_DIM)

    out = gnnstack_forward(x, edge_index, params)
    out = jax.block_until_ready(out)

    assert out.shape == (N, OUTPUT_DIM)
    assert bool(jnp.all(jnp.isfinite(out)))
    # log_softmax rows must exp-sum to ~1
    assert bool(jnp.allclose(jnp.sum(jnp.exp(out), axis=1), 1.0, atol=1e-4))
    # match the f32 pure-JAX reference (bf16 MXU inputs -> loose tolerance)
    ref = reference_forward(x, edge_index, params)
    assert bool(jnp.allclose(out, ref, atol=0.1, rtol=0.1))

    print("KERNEL_OK")
</pallas_src>

<mosaic_0001>
module attributes {stable_mosaic.version = 11 : i64} {
  func.func @gnnstack_kernel(%arg0: i32, %arg1: i32, %arg2: memref<128x128xbf16, #tpu.memory_space<vmem>>, %arg3: memref<128x128xbf16, #tpu.memory_space<vmem>>, %arg4: memref<128x128xbf16, #tpu.memory_space<vmem>>, %arg5: memref<128x128xbf16, #tpu.memory_space<vmem>>, %arg6: memref<128x128xbf16, #tpu.memory_space<vmem>>, %arg7: memref<128x128xf32, #tpu.memory_space<vmem>>, %arg8: memref<1x128xf32, #tpu.memory_space<vmem>>, %arg9: memref<128x128xf32, #tpu.memory_space<vmem>>, %arg10: memref<128x128xf32, #tpu.memory_space<vmem>>) attributes {dimension_semantics = [#tpu.dimension_semantics<parallel>, #tpu.dimension_semantics<arbitrary>], iteration_bounds = array<i64: 1, 1>, scalar_prefetch = 0 : i64, scratch_operands = 1 : i64, tpu.core_type = #tpu.core_type<tc>, window_params = [{transform_indices = @transform_0, window_bounds = array<i64: 128, 128>}, {transform_indices = @transform_1, window_bounds = array<i64: 128, 128>}, {transform_indices = @transform_2, window_bounds = array<i64: 128, 128>}, {pipeline_mode = #tpu.pipeline_mode<synchronous>, transform_indices = @transform_3, window_bounds = array<i64: 128, 128>}, {pipeline_mode = #tpu.pipeline_mode<synchronous>, transform_indices = @transform_4, window_bounds = array<i64: 128, 128>}, {pipeline_mode = #tpu.pipeline_mode<synchronous>, transform_indices = @transform_5, window_bounds = array<i64: 128, 128>}, {pipeline_mode = #tpu.pipeline_mode<synchronous>, transform_indices = @transform_6, window_bounds = array<i64: 1, 128>}, {transform_indices = @transform_7, window_bounds = array<i64: 128, 128>}]} {
    %c0_i32 = arith.constant 0 : i32
    %0 = arith.cmpi eq, %arg1, %c0_i32 : i32
    %1 = arith.extui %0 : i1 to i32
    %c0_i32_0 = arith.constant 0 : i32
    %2 = arith.cmpi ne, %1, %c0_i32_0 : i32
    scf.if %2 {
      %cst_13 = arith.constant 0.000000e+00 : f32
      %15 = vector.broadcast %cst_13 : f32 to vector<128x128xf32>
      %c0_14 = arith.constant 0 : index
      %c0_15 = arith.constant 0 : index
      %16 = vector.load %arg10[%c0_14, %c0_15] : memref<128x128xf32, #tpu.memory_space<vmem>>, vector<128x128xf32>
      tpu.vector_store %arg10[%c0_14, %c0_15], %15 {strides = array<i32>} : memref<128x128xf32, #tpu.memory_space<vmem>>, vector<128x128xf32>,
    } else {
    }
    %c0 = arith.constant 0 : index
    %c0_1 = arith.constant 0 : index
    %3 = vector.load %arg3[%c0, %c0_1] : memref<128x128xbf16, #tpu.memory_space<vmem>>, vector<128x128xbf16>
    %c0_2 = arith.constant 0 : index
    %c0_3 = arith.constant 0 : index
    %4 = vector.load %arg6[%c0_2, %c0_3] : memref<128x128xbf16, #tpu.memory_space<vmem>>, vector<128x128xbf16>
    %cst = arith.constant dense<0.000000e+00> : vector<128x128xf32>
    %5 = tpu.matmul %3, %4, %cst {dimension_numbers = #tpu.dot_dimension_numbers<[1], [0], [0], [1], [0, 0, 1, 1], [], []>} : vector<128x128xbf16>, vector<128x128xbf16>, vector<128x128xf32> -> vector<128x128xf32>
    %6 = arith.truncf %5 : vector<128x128xf32> to vector<128x128xbf16>
    %c0_4 = arith.constant 0 : index
    %c0_5 = arith.constant 0 : index
    %7 = vector.load %arg10[%c0_4, %c0_5] : memref<128x128xf32, #tpu.memory_space<vmem>>, vector<128x128xf32>
    %c0_6 = arith.constant 0 : index
    %c0_7 = arith.constant 0 : index
    %8 = vector.load %arg2[%c0_6, %c0_7] : memref<128x128xbf16, #tpu.memory_space<vmem>>, vector<128x128xbf16>
    %cst_8 = arith.constant dense<0.000000e+00> : vector<128x128xf32>
    %9 = tpu.matmul %8, %6, %cst_8 {dimension_numbers = #tpu.dot_dimension_numbers<[1], [0], [0], [1], [0, 0, 1, 1], [], []>} : vector<128x128xbf16>, vector<128x128xbf16>, vector<128x128xf32> -> vector<128x128xf32>
    %10 = arith.addf %7, %9 : vector<128x128xf32>
    %c0_9 = arith.constant 0 : index
    %c0_10 = arith.constant 0 : index
    %11 = vector.load %arg10[%c0_9, %c0_10] : memref<128x128xf32, #tpu.memory_space<vmem>>, vector<128x128xf32>
    tpu.vector_store %arg10[%c0_9, %c0_10], %10 {strides = array<i32>} : memref<128x128xf32, #tpu.memory_space<vmem>>, vector<128x128xf32>,
    %c0_i32_11 = arith.constant 0 : i32
    %12 = arith.cmpi eq, %arg1, %c0_i32_11 : i32
    %13 = arith.extui %12 : i1 to i32
    %c0_i32_12 = arith.constant 0 : i32
    %14 = arith.cmpi ne, %13, %c0_i32_12 : i32
    scf.if %14 {
      %c0_13 = arith.constant 0 : index
      %c0_14 = arith.constant 0 : index
      %15 = vector.load %arg4[%c0_13, %c0_14] : memref<128x128xbf16, #tpu.memory_space<vmem>>, vector<128x128xbf16>
      %c0_15 = arith.constant 0 : index
      %c0_16 = arith.constant 0 : index
      %16 = vector.load %arg5[%c0_15, %c0_16] : memref<128x128xbf16, #tpu.memory_space<vmem>>, vector<128x128xbf16>
      %cst_17 = arith.constant dense<0.000000e+00> : vector<128x128xf32>
      %17 = tpu.matmul %15, %16, %cst_17 {dimension_numbers = #tpu.dot_dimension_numbers<[1], [0], [0], [1], [0, 0, 1, 1], [], []>} : vector<128x128xbf16>, vector<128x128xbf16>, vector<128x128xf32> -> vector<128x128xf32>
      %c0_18 = arith.constant 0 : index
      %c0_19 = arith.constant 0 : index
      %18 = vector.load %arg10[%c0_18, %c0_19] : memref<128x128xf32, #tpu.memory_space<vmem>>, vector<128x128xf32>
      %19 = arith.addf %17, %18 : vector<128x128xf32>
      %20 = arith.mulf %19, %19 : vector<128x128xf32>
      %cst_20 = arith.constant dense<0.000000e+00> : vector<128xf32>
      %21 = vector.multi_reduction <add>, %20, %cst_20 [1] : vector<128x128xf32> to vector<128xf32>
      %22 = vector.shape_cast %21 : vector<128xf32> to vector<128x1xf32>
      %cst_21 = arith.constant 1.000000e-24 : f32
      %23 = vector.broadcast %cst_21 : f32 to vector<128x1xf32>
      %24 = arith.maximumf %22, %23 : vector<128x1xf32>
      %25 = math.rsqrt %24 : vector<128x1xf32>
      %26 = vector.broadcast %25 : vector<128x1xf32> to vector<128x128xf32>
      %27 = arith.mulf %19, %26 : vector<128x128xf32>
      %cst_22 = arith.constant 0.000000e+00 : f32
      %28 = vector.broadcast %cst_22 : f32 to vector<128x128xf32>
      %29 = arith.maximumf %27, %28 : vector<128x128xf32>
      %c0_23 = arith.constant 0 : index
      %c0_24 = arith.constant 0 : index
      %30 = vector.load %arg7[%c0_23, %c0_24] : memref<128x128xf32, #tpu.memory_space<vmem>>, vector<128x128xf32>
      %cst_25 = arith.constant dense<0.000000e+00> : vector<128x128xf32>
      %31 = tpu.matmul %29, %30, %cst_25 {dimension_numbers = #tpu.dot_dimension_numbers<[1], [0], [0], [1], [0, 0, 1, 1], [], []>} : vector<128x128xf32>, vector<128x128xf32>, vector<128x128xf32> -> vector<128x128xf32>
      %c0_26 = arith.constant 0 : index
      %c0_27 = arith.constant 0 : index
      %32 = vector.load %arg8[%c0_26, %c0_27] : memref<1x128xf32, #tpu.memory_space<vmem>>, vector<1x128xf32>
      %33 = vector.broadcast %32 : vector<1x128xf32> to vector<128x128xf32>
      %34 = arith.addf %31, %33 : vector<128x128xf32>
      %cst_28 = arith.constant dense<0xFF800000> : vector<128xf32>
      %35 = vector.multi_reduction <maximumf>, %34, %cst_28 [1] : vector<128x128xf32> to vector<128xf32>
      %36 = vector.shape_cast %35 : vector<128xf32> to vector<128x1xf32>
      %37 = vector.broadcast %36 : vector<128x1xf32> to vector<128x128xf32>
      %38 = arith.subf %34, %37 : vector<128x128xf32>
      %39 = math.exp %38 : vector<128x128xf32>
      %cst_29 = arith.constant dense<0.000000e+00> : vector<128xf32>
      %40 = vector.multi_reduction <add>, %39, %cst_29 [1] : vector<128x128xf32> to vector<128xf32>
      %41 = vector.shape_cast %40 : vector<128xf32> to vector<128x1xf32>
      %42 = math.log %41 : vector<128x1xf32>
      %43 = vector.broadcast %42 : vector<128x1xf32> to vector<128x128xf32>
      %44 = arith.subf %38, %43 : vector<128x128xf32>
      %c0_30 = arith.constant 0 : index
      %c0_31 = arith.constant 0 : index
      %45 = vector.load %arg9[%c0_30, %c0_31] : memref<128x128xf32, #tpu.memory_space<vmem>>, vector<128x128xf32>
      tpu.vector_store %arg9[%c0_30, %c0_31], %44 {strides = array<i32>} : memref<128x128xf32, #tpu.memory_space<vmem>>, vector<128x128xf32>,
    } else {
    }
    return
  }
  func.func @transform_0(%arg0: i32, %arg1: i32) -> (i32, i32) {
    %c0_i32 = arith.constant 0 : i32
    return %arg0, %arg1 : i32, i32
  }
  func.func @transform_1(%arg0: i32, %arg1: i32) -> (i32, i32) {
    %c0_i32 = arith.constant 0 : i32
    %c0_i32_0 = arith.constant 0 : i32
    return %arg1, %c0_i32 : i32, i32
  }
  func.func @transform_2(%arg0: i32, %arg1: i32) -> (i32, i32) {
    %c0_i32 = arith.constant 0 : i32
    %c0_i32_0 = arith.constant 0 : i32
    return %arg0, %c0_i32 : i32, i32
  }
  func.func @transform_3(%arg0: i32, %arg1: i32) -> (i32, i32) {
    %c0_i32 = arith.constant 0 : i32
    %c0_i32_0 = arith.constant 0 : i32
    %c0_i32_1 = arith.constant 0 : i32
    return %c0_i32, %c0_i32_0 : i32, i32
  }
  func.func @transform_4(%arg0: i32, %arg1: i32) -> (i32, i32) {
    %c0_i32 = arith.constant 0 : i32
    %c0_i32_0 = arith.constant 0 : i32
    %c0_i32_1 = arith.constant 0 : i32
    return %c0_i32, %c0_i32_0 : i32, i32
  }
  func.func @transform_5(%arg0: i32, %arg1: i32) -> (i32, i32) {
    %c0_i32 = arith.constant 0 : i32
    %c0_i32_0 = arith.constant 0 : i32
    %c0_i32_1 = arith.constant 0 : i32
    return %c0_i32, %c0_i32_0 : i32, i32
  }
  func.func @transform_6(%arg0: i32, %arg1: i32) -> (i32, i32) {
    %c0_i32 = arith.constant 0 : i32
    %c0_i32_0 = arith.constant 0 : i32
    %c0_i32_1 = arith.constant 0 : i32
    return %c0_i32, %c0_i32_0 : i32, i32
  }
  func.func @transform_7(%arg0: i32, %arg1: i32) -> (i32, i32) {
    %c0_i32 = arith.constant 0 : i32
    %c0_i32_0 = arith.constant 0 : i32
    return %arg0, %c0_i32 : i32, i32
  }
}

</mosaic_0001>

<bundles_post_ra>
// kernel: gnnstack_forward.1
= control target key start
LH: loop header
LB: loop body
LE: loop exit
PB: predicated region body
PF: predicated region fallthrough
CT: control target
= control target key end

     0   :  { %s2077_s4 = inlined_call_operand.vmem [shape: bf16[128,128], index: 4, kind: input, shape index: {}]   ;;  %s2078_s1 = inlined_call_operand.vmem [shape: bf16[128,128], index: 1, kind: input, shape index: {}, may-alias: {1,2}]   ;;  %s2079_s0 = inlined_call_operand.vmem [shape: bf16[128,128], index: 0, kind: input, shape index: {}]   ;;  %s2080_s3 = inlined_call_operand.vmem [shape: bf16[128,128], index: 3, kind: input, shape index: {}]   ;;  %s2081_s2 = inlined_call_operand.vmem [shape: bf16[128,128], index: 2, kind: input, shape index: {}, may-alias: {1,2}]   ;;  %s2082_s5 = inlined_call_operand.vmem [shape: f32[128,128], index: 5, kind: input, shape index: {}]   ;;  %s2083_s6 = inlined_call_operand.vmem [shape: f32[1,128], index: 6, kind: input, shape index: {}]   ;;  %s2084_s7 = inlined_call_operand.vmem [shape: f32[128,128], index: 7, kind: output, shape index: {}]  }
   0x1   :  { %v1514_v0 = vld [vmem:[%s2077_s4] sm:$0xff]   ;;  %v1515_v1 = vld [vmem:[%s2077_s4 + $0x8] sm:$0xff]   ;;  %v1516_v2 = vld [vmem:[%s2077_s4 + $0x10] sm:$0xff]  }
   0x2   :  { %1314 = vmatprep.subr.bf16.mxu0 %v1514_v0  ;;  %v1517_v3 = vld [vmem:[%s2077_s4 + $0x18] sm:$0xff]   ;;  %v1522_v4 = vld [vmem:[%s2078_s1] sm:$0xff]   ;;  %v1519_v6 = vld [vmem:[%s2077_s4 + $0x28] sm:$0xff]  }
   0x3   :  { %1315 = vmatpush3.bf16.msra.mxu0 %v1514_v0  ;;  %1330 = vmatprep.mubr.bf16.mxu0 %v1522_v4  ;;  %v1518_v5 = vld [vmem:[%s2077_s4 + $0x20] sm:$0xff]   ;;  %v1520_v7 = vld [vmem:[%s2077_s4 + $0x30] sm:$0xff]   ;;  %v1521_v8 = vld [vmem:[%s2077_s4 + $0x38] sm:$0xff]  }
   0x4   :  { %1316 = vmatprep.subr.bf16.mxu0 %v1515_v1  ;;  %v1523_v9 = vld [vmem:[%s2078_s1 + $0x8] sm:$0xff]   ;;  %v1524_v10 = vld [vmem:[%s2078_s1 + $0x10] sm:$0xff]   ;;  %v1525_v11 = vld [vmem:[%s2078_s1 + $0x18] sm:$0xff]  }
   0x5   :  { %v1526_v12 = vld [vmem:[%s2078_s1 + $0x20] sm:$0xff]   ;;  %v1527_v13 = vld [vmem:[%s2078_s1 + $0x28] sm:$0xff]   ;;  %v1528_v14 = vld [vmem:[%s2078_s1 + $0x30] sm:$0xff]  }
   0x6   :  { %v1529_v15 = vld [vmem:[%s2078_s1 + $0x38] sm:$0xff]   ;;  %v1530_v16 = vld [vmem:[%s2079_s0] sm:$0xff]   ;;  %v1531_v42 = vld [vmem:[%s2079_s0 + $0x8] sm:$0xff]  }
   0x7   :  { %1317 = vmatpush3.bf16.msra.mxu0 %v1515_v1  ;;  %1362 = vmatprep.mubr.bf16.mxu1 %v1530_v16  ;;  %v1532_v41 = vld [vmem:[%s2080_s3] sm:$0xff]   ;;  %v1534_v43 = vld [vmem:[%s2079_s0 + $0x10] sm:$0xff]   ;;  %v1533_v44 = vld [vmem:[%s2080_s3 + $0x8] sm:$0xff]  }
   0x8   :  { %1318 = vmatprep.subr.bf16.mxu0 %v1516_v2  ;;  %v1536_v45 = vld [vmem:[%s2080_s3 + $0x10] sm:$0xff]   ;;  %v1535_v46 = vld [vmem:[%s2079_s0 + $0x18] sm:$0xff]   ;;  %v1538_v47 = vld [vmem:[%s2079_s0 + $0x20] sm:$0xff]  }
   0x9   :  { %v1537_v48 = vld [vmem:[%s2080_s3 + $0x18] sm:$0xff]   ;;  %v1540_v49 = vld [vmem:[%s2080_s3 + $0x20] sm:$0xff]   ;;  %v1539_v50 = vld [vmem:[%s2079_s0 + $0x28] sm:$0xff]  }
   0xa   :  { %v1542_v51 = vld [vmem:[%s2079_s0 + $0x30] sm:$0xff]   ;;  %v1541_v52 = vld [vmem:[%s2080_s3 + $0x28] sm:$0xff]   ;;  %v1543_v54 = vld [vmem:[%s2079_s0 + $0x38] sm:$0xff]  }
   0xb   :  { %1319 = vmatpush3.bf16.msra.mxu0 %v1516_v2  ;;  %v1544_v53 = vld [vmem:[%s2080_s3 + $0x30] sm:$0xff]   ;;  %v1546_v55 = vld [vmem:[%s2081_s2] sm:$0xff]   ;;  %v1545_v56 = vld [vmem:[%s2080_s3 + $0x38] sm:$0xff]  }
   0xc   :  { %1320 = vmatprep.subr.bf16.mxu0 %v1517_v3  ;;  %v1547_v57 = vld [vmem:[%s2081_s2 + $0x8] sm:$0xff]   ;;  %v1548_v58 = vld [vmem:[%s2081_s2 + $0x10] sm:$0xff]   ;;  %v1549_v59 = vld [vmem:[%s2081_s2 + $0x18] sm:$0xff]  }
   0xd   :  { %v1550_v60 = vld [vmem:[%s2081_s2 + $0x20] sm:$0xff]   ;;  %v1551_v61 = vld [vmem:[%s2081_s2 + $0x28] sm:$0xff]   ;;  %v1552_v62 = vld [vmem:[%s2081_s2 + $0x30] sm:$0xff]  }
   0xe   :  { %v1553_v63 = vld [vmem:[%s2081_s2 + $0x38] sm:$0xff]   ;;  %v845_v0 = vld [vmem:[%s2082_s5] sm:$0xff]  ;;  %v846_v1 = vld [vmem:[%s2082_s5 + $0x8] sm:$0xff] }
   0xf   :  { %1321 = vmatpush3.bf16.msra.mxu0 %v1517_v3  ;;  %v847_v2 = vld [vmem:[%s2082_s5 + $0x10] sm:$0xff]  ;;  %v1466_v3 = vpack.c.bf16 %v846_v1, %v845_v0  ;;  %v848_v4 = vld [vmem:[%s2082_s5 + $0x18] sm:$0xff] }
  0x10   :  { %1322 = vmatprep.subr.bf16.mxu0 %v1518_v5 }
  0x13   :  { %1323 = vmatpush3.bf16.msra.mxu0 %v1518_v5  ;;  %v1470_v5 = vpack.c.bf16 %v848_v4, %v847_v2 }
  0x14   :  { %1324 = vmatprep.subr.bf16.mxu0 %v1519_v6 }
  0x17   :  { %1325 = vmatpush3.bf16.msra.mxu0 %v1519_v6  ;;  %v849_v6 = vld [vmem:[%s2082_s5 + $0x20] sm:$0xff] }
  0x18   :  { %1326 = vmatprep.subr.bf16.mxu0 %v1520_v7 }
  0x1b   :  { %1327 = vmatpush3.bf16.msra.mxu0 %v1520_v7  ;;  %v850_v7 = vld [vmem:[%s2082_s5 + $0x28] sm:$0xff] }
  0x1c   :  { %1328 = vmatprep.subr.bf16.mxu0 %v1521_v8 }
  0x1f   :  { %1329 = vmatpush3.bf16.msra.mxu0 %v1521_v8  ;;  %v1474_v8 = vpack.c.bf16 %v850_v7, %v849_v6 }
  0x20   :  { %1467 = vmatprep.subr.bf16.mxu0 %v1466_v3 }
  0x22   :  { %1331 = vmatmul.mubr.bf16.vlgmr.msra.gmra.mrb[0].mxu0 %v1523_v9 }
  0x23   :  { %1334 = vmatprep.mubr.bf16.mxu0 %v1524_v10  ;;  %1469 = vmatpush3.bf16.msra.mxu0 %v1466_v3 }
  0x24   :  { %1471 = vmatprep.subr.bf16.mxu0 %v1470_v5 }
  0x27   :  { %1473 = vmatpush3.bf16.msra.mxu0 %v1470_v5 }
  0x28   :  { %1475 = vmatprep.subr.bf16.mxu0 %v1474_v8 }
  0x2a   :  { %1335 = vmatmul.mubr.bf16.gmra.mrb[4].mxu0 %v1525_v11 }
  0x2b   :  { %1338 = vmatprep.mubr.bf16.mxu0 %v1526_v12  ;;  %1477 = vmatpush3.bf16.msra.mxu0 %v1474_v8 }
  0x32   :  { %1339 = vmatmul.mubr.bf16.gmra.mrb[8].mxu0 %v1527_v13 }
  0x33   :  { %1342 = vmatprep.mubr.bf16.mxu0 %v1528_v14 }
  0x3a   :  { %1343 = vmatmul.mubr.bf16.gmra.mrb[12].mxu0 %v1529_v15 }
  0xf5   :  { %v1332_v17 = vpop.f32.mrb[0].mxu0 }
  0xf6   :  { %v209_v18 = vpop.f32.mrb[1].mxu0 }
  0xf7   :  { %v1333_v19 = vpop.f32.mrb[2].mxu0 }
  0xf8   :  { %v273_v20 = vpack.c.bf16 %v1333_v19, %v1332_v17  ;;  %v212_v21 = vpop.f32.mrb[3].mxu0 }
  0xf9   :  { %v272_v22 = vpack.c.bf16 %v212_v21, %v209_v18 }
  0xfb   :  { %1346 = vmatprep.subr.bf16.mxu1 %v272_v22 }
  0xfc   :  { %1347 = vmatpush3.bf16.msra.mxu1 %v272_v22 }
  0xfd   :  { %v1336_v23 = vpop.f32.mrb[4].mxu0  ;;  %1348 = vmatprep.subr.bf16.mxu1 %v273_v20 }
  0xfe   :  { %v225_v24 = vpop.f32.mrb[5].mxu0 }
  0xff   :  { %v1337_v25 = vpop.f32.mrb[6].mxu0 }
 0x100   :  { %v275_v26 = vpack.c.bf16 %v1337_v25, %v1336_v23  ;;  %v228_v27 = vpop.f32.mrb[7].mxu0  ;;  %1349 = vmatpush3.bf16.msra.mxu1 %v273_v20 }
 0x101   :  { %v274_v28 = vpack.c.bf16 %v228_v27, %v225_v24  ;;  %v852_v27 = vld [vmem:[%s2082_s5 + $0x38] sm:$0xff] }
 0x103   :  { %1350 = vmatprep.subr.bf16.mxu1 %v274_v28 }
 0x104   :  { %1351 = vmatpush3.bf16.msra.mxu1 %v274_v28 }
 0x105   :  { %v1340_v29 = vpop.f32.mrb[8].mxu0  ;;  %1352 = vmatprep.subr.bf16.mxu1 %v275_v26 }
 0x106   :  { %v241_v30 = vpop.f32.mrb[9].mxu0 }
 0x107   :  { %v1341_v31 = vpop.f32.mrb[10].mxu0 }
 0x108   :  { %v277_v32 = vpack.c.bf16 %v1341_v31, %v1340_v29  ;;  %v244_v33 = vpop.f32.mrb[11].mxu0  ;;  %1353 = vmatpush3.bf16.msra.mxu1 %v275_v26  ;;  %v851_v26 = vld [vmem:[%s2082_s5 + $0x30] sm:$0xff] }
 0x109   :  { %v276_v34 = vpack.c.bf16 %v244_v33, %v241_v30  ;;  %v1478_v29 = vpack.c.bf16 %v852_v27, %v851_v26 }
 0x10b   :  { %1354 = vmatprep.subr.bf16.mxu1 %v276_v34  ;;  %1479 = vmatprep.subr.bf16.mxu0 %v1478_v29 }
 0x10c   :  { %1355 = vmatpush3.bf16.msra.mxu1 %v276_v34  ;;  %1481 = vmatpush3.bf16.msra.mxu0 %v1478_v29  ;;  %v853_v34 = vld [vmem:[%s2082_s5 + $0x40] sm:$0xff] }
 0x10d   :  { %v1344_v35 = vpop.f32.mrb[12].mxu0  ;;  %1356 = vmatprep.subr.bf16.mxu1 %v277_v32 }
 0x10e   :  { %v257_v36 = vpop.f32.mrb[13].mxu0 }
 0x10f   :  { %v1345_v37 = vpop.f32.mrb[14].mxu0 }
 0x110   :  { %v279_v38 = vpack.c.bf16 %v1345_v37, %v1344_v35  ;;  %v260_v39 = vpop.f32.mrb[15].mxu0  ;;  %1357 = vmatpush3.bf16.msra.mxu1 %v277_v32  ;;  %v854_v35 = vld [vmem:[%s2082_s5 + $0x48] sm:$0xff] }
 0x111   :  { %v278_v40 = vpack.c.bf16 %v260_v39, %v257_v36  ;;  %v1482_v36 = vpack.c.bf16 %v854_v35, %v853_v34 }
 0x113   :  { %1358 = vmatprep.subr.bf16.mxu1 %v278_v40  ;;  %1483 = vmatprep.subr.bf16.mxu0 %v1482_v36 }
 0x114   :  { %1359 = vmatpush3.bf16.msra.mxu1 %v278_v40  ;;  %1485 = vmatpush3.bf16.msra.mxu0 %v1482_v36  ;;  %v855_v40 = vld [vmem:[%s2082_s5 + $0x50] sm:$0xff] }
 0x115   :  { %1360 = vmatprep.subr.bf16.mxu1 %v279_v38 }
 0x118   :  { %1361 = vmatpush3.bf16.msra.mxu1 %v279_v38 }
 0x119   :  { %1378 = vmatprep.subr.bf16.mxu1 %v1532_v41 }
 0x11b   :  { %1363 = vmatmul.mubr.bf16.vlgmr.msra.gmra.mrb[0].mxu1 %v1531_v42 }
 0x11c   :  { %1379 = vmatpush3.bf16.msra.mxu1 %v1532_v41  ;;  %1366 = vmatprep.mubr.bf16.mxu1 %v1534_v43  ;;  %v856_v41 = vld [vmem:[%s2082_s5 + $0x58] sm:$0xff] }
 0x11d   :  { %1380 = vmatprep.subr.bf16.mxu1 %v1533_v44  ;;  %v1486_v43 = vpack.c.bf16 %v856_v41, %v855_v40 }
 0x11f   :  { %1487 = vmatprep.subr.bf16.mxu0 %v1486_v43 }
 0x120   :  { %1381 = vmatpush3.bf16.msra.mxu1 %v1533_v44  ;;  %1489 = vmatpush3.bf16.msra.mxu0 %v1486_v43 }
 0x121   :  { %1382 = vmatprep.subr.bf16.mxu1 %v1536_v45 }
 0x123   :  { %1367 = vmatmul.mubr.bf16.gmra.mrb[4].mxu1 %v1535_v46 }
 0x124   :  { %1383 = vmatpush3.bf16.msra.mxu1 %v1536_v45  ;;  %1370 = vmatprep.mubr.bf16.mxu1 %v1538_v47 }
 0x125   :  { %1384 = vmatprep.subr.bf16.mxu1 %v1537_v48 }
 0x128   :  { %1385 = vmatpush3.bf16.msra.mxu1 %v1537_v48  ;;  %v857_v48 = vld [vmem:[%s2082_s5 + $0x60] sm:$0xff] }
 0x129   :  { %1386 = vmatprep.subr.bf16.mxu1 %v1540_v49 }
 0x12b   :  { %1371 = vmatmul.mubr.bf16.gmra.mrb[8].mxu1 %v1539_v50 }
 0x12c   :  { %1387 = vmatpush3.bf16.msra.mxu1 %v1540_v49  ;;  %1374 = vmatprep.mubr.bf16.mxu1 %v1542_v51  ;;  %v858_v49 = vld [vmem:[%s2082_s5 + $0x68] sm:$0xff] }
 0x12d   :  { %1388 = vmatprep.subr.bf16.mxu1 %v1541_v52  ;;  %v1490_v50 = vpack.c.bf16 %v858_v49, %v857_v48 }
 0x12f   :  { %1491 = vmatprep.subr.bf16.mxu0 %v1490_v50 }
 0x130   :  { %1389 = vmatpush3.bf16.msra.mxu1 %v1541_v52  ;;  %1493 = vmatpush3.bf16.msra.mxu0 %v1490_v50 }
 0x131   :  { %1390 = vmatprep.subr.bf16.mxu1 %v1544_v53 }
 0x133   :  { %1375 = vmatmul.mubr.bf16.gmra.mrb[12].mxu1 %v1543_v54  ;;  %v860_v54 = vld [vmem:[%s2082_s5 + $0x78] sm:$0xff] }
 0x134   :  { %1391 = vmatpush3.bf16.msra.mxu1 %v1544_v53  ;;  %1394 = vmatprep.mubr.bf16.mxu1 %v1546_v55  ;;  %v859_v53 = vld [vmem:[%s2082_s5 + $0x70] sm:$0xff] }
 0x135   :  { %1392 = vmatprep.subr.bf16.mxu1 %v1545_v56  ;;  %v1494_v55 = vpack.c.bf16 %v860_v54, %v859_v53 }
 0x137   :  { %1495 = vmatprep.subr.bf16.mxu0 %v1494_v55 }
 0x138   :  { %1393 = vmatpush3.bf16.msra.mxu1 %v1545_v56  ;;  %1497 = vmatpush3.bf16.msra.mxu0 %v1494_v55 }
 0x13b   :  { %1395 = vmatmul.mubr.bf16.vlgmr.msra.gmra.mrb[0].mxu1 %v1547_v57 }
 0x13c   :  { %1398 = vmatprep.mubr.bf16.mxu1 %v1548_v58 }
 0x143   :  { %1399 = vmatmul.mubr.bf16.gmra.mrb[4].mxu1 %v1549_v59 }
 0x144   :  { %1402 = vmatprep.mubr.bf16.mxu1 %v1550_v60 }
 0x14b   :  { %1403 = vmatmul.mubr.bf16.gmra.mrb[8].mxu1 %v1551_v61 }
 0x14c   :  { %1406 = vmatprep.mubr.bf16.mxu1 %v1552_v62 }
 0x153   :  { %1407 = vmatmul.mubr.bf16.gmra.mrb[12].mxu1 %v1553_v63 }
 0x20e   :  { %v1828_v9 = vpop.f32.mrb[0].mxu1 }
 0x20f   :  { %v1830_v10 = vpop.f32.mrb[1].mxu1  ;;  %v735_v11 = vmul.f32 %v1828_v9, %v1828_v9 }
 0x210   :  { %v1834_v12 = vpop.f32.mrb[2].mxu1  ;;  %v733_v13 = vmul.f32 %v1830_v10, %v1830_v10 }
 0x211   :  { %753 = vadd.xlane.f32.xlu1 %v735_v11  ;;  %v1838_v14 = vpop.f32.mrb[3].mxu1  ;;  %v736_v15 = vmul.f32 %v1834_v12, %v1834_v12 }
 0x212   :  { %749 = vadd.xlane.f32.xlu0 %v733_v13  ;;  %v734_v16 = vmul.f32 %v1838_v14, %v1838_v14 }
 0x215   :  { %755 = vadd.xlane.f32.xlu1 %v736_v15 }
 0x216   :  { %751 = vadd.xlane.f32.xlu0 %v734_v16  ;;  %v1844_v17 = vpop.f32.mrb[4].mxu1 }
 0x217   :  { %v1846_v18 = vpop.f32.mrb[5].mxu1  ;;  %v739_v23 = vmul.f32 %v1844_v17, %v1844_v17 }
 0x218   :  { %v1848_v19 = vpop.f32.mrb[6].mxu1  ;;  %v737_v20 = vmul.f32 %v1846_v18, %v1846_v18 }
 0x219   :  { %v1852_v21 = vpop.f32.mrb[7].mxu1  ;;  %v740_v25 = vmul.f32 %v1848_v19, %v1848_v19 }
 0x21a   :  { %757 = vadd.xlane.f32.xlu0 %v737_v20  ;;  %v738_v22 = vmul.f32 %v1852_v21, %v1852_v21 }
 0x21c   :  { %759 = vadd.xlane.f32.xlu1 %v738_v22 }
 0x21e   :  { %761 = vadd.xlane.f32.xlu0 %v739_v23  ;;  %v1858_v24 = vpop.f32.mrb[8].mxu1 }
 0x21f   :  { %v1868_v28 = vpop.f32.mrb[9].mxu1  ;;  %v743_v37 = vmul.f32 %v1858_v24, %v1858_v24 }
 0x220   :  { %763 = vadd.xlane.f32.xlu1 %v740_v25  ;;  %v1870_v30 = vpop.f32.mrb[10].mxu1  ;;  %v741_v31 = vmul.f32 %v1868_v28, %v1868_v28 }
 0x221   :  { %v1874_v32 = vpop.f32.mrb[11].mxu1  ;;  %v744_v39 = vmul.f32 %v1870_v30, %v1870_v30 }
 0x222   :  { %765 = vadd.xlane.f32.xlu0 %v741_v31  ;;  %v742_v33 = vmul.f32 %v1874_v32, %v1874_v32 }
 0x224   :  { %767 = vadd.xlane.f32.xlu1 %v742_v33 }
 0x226   :  { %769 = vadd.xlane.f32.xlu0 %v743_v37  ;;  %v1886_v38 = vpop.f32.mrb[12].mxu1 }
 0x227   :  { %v1896_v42 = vpop.f32.mrb[13].mxu1  ;;  %v747_v51 = vmul.f32 %v1886_v38, %v1886_v38 }
 0x228   :  { %771 = vadd.xlane.f32.xlu1 %v744_v39  ;;  %v1898_v44 = vpop.f32.mrb[14].mxu1  ;;  %v745_v45 = vmul.f32 %v1896_v42, %v1896_v42 }
 0x229   :  { %v1902_v46 = vpop.f32.mrb[15].mxu1  ;;  %v748_v52 = vmul.f32 %v1898_v44, %v1898_v44 }
 0x22a   :  { %v746_v47 = vmul.f32 %v1902_v46, %v1902_v46  ;;  %773 = vadd.xlane.f32.xlu0 %v745_v45 }
 0x22c   :  { %775 = vadd.xlane.f32.xlu1 %v746_v47 }
 0x22e   :  { %777 = vadd.xlane.f32.xlu0 %v747_v51 }
 0x230   :  { %779 = vadd.xlane.f32.xlu1 %v748_v52 }
 0x29e   :  { %v754_v56 = vpop.xlane.xlu1 %753 }
 0x29f   :  { %v783_v57 = vmax.f32 %v754_v56, 1e-24  ;;  %v750_v58 = vpop.xlane.xlu0 %749 }
 0x2a0   :  { %v781_v59 = vmax.f32 %v750_v58, 1e-24 }
 0x2a2   :  { %1554 = vrsqrt.f32 %v781_v59  ;;  %v756_v60 = vpop.xlane.xlu1 %755 }
 0x2a3   :  { %1556 = vrsqrt.f32 %v783_v57  ;;  %v784_v61 = vmax.f32 %v756_v60, 1e-24  ;;  %v752_v62 = vpop.xlane.xlu0 %751 }
 0x2a4   :  { %v782_v63 = vmax.f32 %v752_v62, 1e-24 }
 0x2a5   :  { %1558 = vrsqrt.f32 %v784_v61 }
 0x2a6   :  { %1560 = vrsqrt.f32 %v782_v63 }
 0x2a7   :  { %v758_v0 = vpop.xlane.xlu0 %757 }
 0x2a8   :  { %v785_v1 = vmax.f32 %v758_v0, 1e-24 }
 0x2a9   :  { %v760_v2 = vpop.xlane.xlu1 %759 }
 0x2aa   :  { %1562 = vrsqrt.f32 %v785_v1  ;;  %v786_v3 = vmax.f32 %v760_v2, 1e-24 }
 0x2ab   :  { %v762_v4 = vpop.xlane.xlu0 %761 }
 0x2ac   :  { %v1555_v5 = vpop.eup %1554  ;;  %1564 = vrsqrt.f32 %v786_v3  ;;  %v787_v6 = vmax.f32 %v762_v4, 1e-24 }
 0x2ad   :  { %v1557_v7 = vpop.eup %1556  ;;  %v764_v8 = vpop.xlane.xlu1 %763  ;;  %v813_v11 = vmul.f32 %v1555_v5, %v1830_v10 }
 0x2ae   :  { %1566 = vrsqrt.f32 %v787_v6  ;;  %v788_v13 = vmax.f32 %v764_v8, 1e-24  ;;  %v815_v25 = vmul.f32 %v1557_v7, %v1828_v9 }
 0x2af   :  { %v1559_v15 = vpop.eup %1558  ;;  %v766_v16 = vpop.xlane.xlu0 %765  ;;  %v829_v20 = vmax.f32 %v813_v11, 0.0 }
 0x2b0   :  { %v1561_v22 = vpop.eup %1560  ;;  %1568 = vrsqrt.f32 %v788_v13  ;;  %v789_v23 = vmax.f32 %v766_v16, 1e-24  ;;  %v816_v10 = vmul.f32 %v1559_v15, %v1834_v12  ;;  %v831_v36 = vmax.f32 %v815_v25, 0.0 }
 0x2b1   :  { %v814_v26 = vmul.f32 %v1561_v22, %v1838_v14  ;;  %1442 = vmatprep.mubr.f32.mxu0 %v829_v20  ;;  %v768_v27 = vpop.xlane.xlu1 %767 }
 0x2b2   :  { %1570 = vrsqrt.f32 %v789_v23  ;;  %v790_v29 = vmax.f32 %v768_v27, 1e-24  ;;  %v832_v41 = vmax.f32 %v816_v10, 0.0 }
 0x2b3   :  { %v770_v31 = vpop.xlane.xlu0 %769  ;;  %v830_v33 = vmax.f32 %v814_v26, 0.0 }
 0x2b4   :  { %v1563_v34 = vpop.eup %1562  ;;  %1572 = vrsqrt.f32 %v790_v29  ;;  %v791_v35 = vmax.f32 %v770_v31, 1e-24 }
 0x2b5   :  { %1443 = vmatmul.mubr.f32.vlgmr.msra.gmra.mrb[16].mxu0 %v830_v33  ;;  %v772_v37 = vpop.xlane.xlu1 %771  ;;  %v817_v39 = vmul.f32 %v1563_v34, %v1846_v18 }
 0x2b6   :  { %v1565_v40 = vpop.eup %1564  ;;  %1574 = vrsqrt.f32 %v791_v35  ;;  %v792_v9 = vmax.f32 %v772_v37, 1e-24  ;;  %1445 = vmatprep.mubr.f32.mxu0 %v831_v36 }
 0x2b7   :  { %v774_v14 = vpop.xlane.xlu0 %773  ;;  %v833_v43 = vmax.f32 %v817_v39, 0.0  ;;  %v818_v45 = vmul.f32 %v1565_v40, %v1852_v21 }
 0x2b8   :  { %v1567_v47 = vpop.eup %1566  ;;  %1576 = vrsqrt.f32 %v792_v9  ;;  %v793_v12 = vmax.f32 %v774_v14, 1e-24 }
 0x2b9   :  { %1446 = vmatmul.mubr.f32.gmra.mrb[18].mxu0 %v832_v41  ;;  %v776_v48 = vpop.xlane.xlu1 %775  ;;  %v819_v49 = vmul.f32 %v1567_v47, %v1844_v17  ;;  %v834_v52 = vmax.f32 %v818_v45, 0.0 }
 0x2ba   :  { %v1569_v50 = vpop.eup %1568  ;;  %1578 = vrsqrt.f32 %v793_v12  ;;  %v794_v51 = vmax.f32 %v776_v48, 1e-24  ;;  %1448 = vmatprep.mubr.f32.mxu0 %v833_v43 }
 0x2bb   :  { %v778_v18 = vpop.xlane.xlu0 %777  ;;  %v835_v53 = vmax.f32 %v819_v49, 0.0  ;;  %v820_v54 = vmul.f32 %v1569_v50, %v1848_v19 }
 0x2bc   :  { %v1571_v55 = vpop.eup %1570  ;;  %1580 = vrsqrt.f32 %v794_v51  ;;  %v795_v56 = vmax.f32 %v778_v18, 1e-24 }
 0x2bd   :  { %1449 = vmatmul.mubr.f32.gmra.mrb[20].mxu0 %v834_v52  ;;  %v780_v21 = vpop.xlane.xlu1 %779  ;;  %v821_v57 = vmul.f32 %v1571_v55, %v1868_v28  ;;  %v836_v17 = vmax.f32 %v820_v54, 0.0 }
 0x2be   :  { %v1573_v58 = vpop.eup %1572  ;;  %1582 = vrsqrt.f32 %v795_v56  ;;  %v796_v59 = vmax.f32 %v780_v21, 1e-24  ;;  %1451 = vmatprep.mubr.f32.mxu0 %v835_v53 }
 0x2bf   :  { %v837_v60 = vmax.f32 %v821_v57, 0.0  ;;  %v822_v61 = vmul.f32 %v1573_v58, %v1874_v32 }
 0x2c0   :  { %v1575_v62 = vpop.eup %1574  ;;  %1584 = vrsqrt.f32 %v796_v59 }
 0x2c1   :  { %1452 = vmatmul.mubr.f32.gmra.mrb[22].mxu0 %v836_v17  ;;  %v823_v19 = vmul.f32 %v1575_v62, %v1858_v24  ;;  %v838_v0 = vmax.f32 %v822_v61, 0.0 }
 0x2c2   :  { %v1577_v63 = vpop.eup %1576  ;;  %1454 = vmatprep.mubr.f32.mxu0 %v837_v60 }
 0x2c3   :  { %v839_v1 = vmax.f32 %v823_v19, 0.0  ;;  %v824_v2 = vmul.f32 %v1577_v63, %v1870_v30 }
 0x2c4   :  { %v1579_v28 = vpop.eup %1578 }
 0x2c5   :  { %1455 = vmatmul.mubr.f32.gmra.mrb[24].mxu0 %v838_v0  ;;  %v825_v3 = vmul.f32 %v1579_v28, %v1896_v42  ;;  %v840_v5 = vmax.f32 %v824_v2, 0.0  ;;  %v1233_v42 = vld [vmem:[%s2083_s6] ss:$0 sm:$0xff] }
 0x2c6   :  { %v1581_v4 = vpop.eup %1580  ;;  %1457 = vmatprep.mubr.f32.mxu0 %v839_v1 }
 0x2c7   :  { %v841_v6 = vmax.f32 %v825_v3, 0.0  ;;  %v826_v32 = vmul.f32 %v1581_v4, %v1902_v46 }
 0x2c8   :  { %v1583_v7 = vpop.eup %1582 }
 0x2c9   :  { %1458 = vmatmul.mubr.f32.gmra.mrb[26].mxu0 %v840_v5  ;;  %v827_v24 = vmul.f32 %v1583_v7, %v1886_v38  ;;  %v842_v11 = vmax.f32 %v826_v32, 0.0 }
 0x2ca   :  { %v1585_v8 = vpop.eup %1584  ;;  %1460 = vmatprep.mubr.f32.mxu0 %v841_v6 }
 0x2cb   :  { %v843_v13 = vmax.f32 %v827_v24, 0.0  ;;  %v828_v30 = vmul.f32 %v1585_v8, %v1898_v44 }
 0x2cd   :  { %1461 = vmatmul.mubr.f32.gmra.mrb[28].mxu0 %v842_v11  ;;  %v844_v15 = vmax.f32 %v828_v30, 0.0 }
 0x2ce   :  { %1463 = vmatprep.mubr.f32.mxu0 %v843_v13 }
 0x2d1   :  { %1464 = vmatmul.mubr.f32.gmra.mrb[30].mxu0 %v844_v15 }
 0x388   :  { %v1444_v16 = vpop.f32.mrb[16].mxu0 }
 0x389   :  { %v940_v46 = vadd.f32 %v1444_v16, %v1233_v42  ;;  %v934_v20 = vpop.f32.mrb[17].mxu0 }
 0x38a   :  { %v935_v22 = vadd.f32 %v1233_v42, %v934_v20 }
 0x38b   :  { %1015 = vmax.xlane.f32.xlu1 %v940_v46 }
 0x38c   :  { %v1447_v38 = vpop.f32.mrb[18].mxu0  ;;  %1013 = vmax.xlane.f32.xlu0 %v935_v22 }
 0x38d   :  { %v950_v23 = vadd.f32 %v1447_v38, %v1233_v42  ;;  %v944_v25 = vpop.f32.mrb[19].mxu0 }
 0x38e   :  { %v945_v26 = vadd.f32 %v1233_v42, %v944_v25 }
 0x38f   :  { %1019 = vmax.xlane.f32.xlu1 %v950_v23 }
 0x390   :  { %v1450_v44 = vpop.f32.mrb[20].mxu0  ;;  %1017 = vmax.xlane.f32.xlu0 %v945_v26 }
 0x391   :  { %v960_v27 = vadd.f32 %v1450_v44, %v1233_v42  ;;  %v954_v29 = vpop.f32.mrb[21].mxu0 }
 0x392   :  { %v955_v31 = vadd.f32 %v1233_v42, %v954_v29 }
 0x393   :  { %1023 = vmax.xlane.f32.xlu1 %v960_v27 }
 0x394   :  { %v1453_v33 = vpop.f32.mrb[22].mxu0  ;;  %1021 = vmax.xlane.f32.xlu0 %v955_v31 }
 0x395   :  { %v970_v10 = vadd.f32 %v1453_v33, %v1233_v42  ;;  %v964_v34 = vpop.f32.mrb[23].mxu0 }
 0x396   :  { %v965_v35 = vadd.f32 %v1233_v42, %v964_v34 }
 0x397   :  { %1027 = vmax.xlane.f32.xlu1 %v970_v10 }
 0x398   :  { %v1456_v36 = vpop.f32.mrb[24].mxu0  ;;  %1025 = vmax.xlane.f32.xlu0 %v965_v35 }
 0x399   :  { %v980_v37 = vadd.f32 %v1456_v36, %v1233_v42  ;;  %v974_v39 = vpop.f32.mrb[25].mxu0 }
 0x39a   :  { %v975_v40 = vadd.f32 %v1233_v42, %v974_v39 }
 0x39b   :  { %1031 = vmax.xlane.f32.xlu1 %v980_v37 }
 0x39c   :  { %v1459_v9 = vpop.f32.mrb[26].mxu0  ;;  %1029 = vmax.xlane.f32.xlu0 %v975_v40 }
 0x39d   :  { %v1941_v14 = vadd.f32 %v1459_v9, %v1233_v42  ;;  %v984_v41 = vpop.f32.mrb[27].mxu0 }
 0x39e   :  { %v1943_v43 = vadd.f32 %v1233_v42, %v984_v41 }
 0x39f   :  { %1035 = vmax.xlane.f32.xlu1 %v1941_v14 }
 0x3a0   :  { %1033 = vmax.xlane.f32.xlu0 %v1943_v43  ;;  %v1462_v45 = vpop.f32.mrb[28].mxu0 }
 0x3a1   :  { %v1947_v47 = vadd.f32 %v1462_v45, %v1233_v42  ;;  %v994_v12 = vpop.f32.mrb[29].mxu0 }
 0x3a2   :  { %v1949_v48 = vadd.f32 %v1233_v42, %v994_v12 }
 0x3a3   :  { %1039 = vmax.xlane.f32.xlu1 %v1947_v47 }
 0x3a4   :  { %1037 = vmax.xlane.f32.xlu0 %v1949_v48  ;;  %v1465_v49 = vpop.f32.mrb[30].mxu0 }
 0x3a5   :  { %v1953_v50 = vadd.f32 %v1465_v49, %v1233_v42  ;;  %v1004_v51 = vpop.f32.mrb[31].mxu0 }
 0x3a6   :  { %v1955_v18 = vadd.f32 %v1233_v42, %v1004_v51 }
 0x3a7   :  { %1043 = vmax.xlane.f32.xlu1 %v1953_v50 }
 0x3a8   :  { %1041 = vmax.xlane.f32.xlu0 %v1955_v18 }
 0x418   :  { %v1016_v52 = vpop.xlane.xlu1 %1015 }
 0x419   :  { %v1959_v53 = vsub.f32 %v940_v46, %v1016_v52  ;;  %v1014_v54 = vpop.xlane.xlu0 %1013 }
 0x41a   :  { %v1961_v55 = vsub.f32 %v935_v22, %v1014_v54 }
 0x41b   :  { %v1063_v56 = vmul.f32 1.442695, %v1959_v53 }
 0x41c   :  { %v1061_v21 = vmul.f32 1.442695, %v1961_v55  ;;  %v1020_v57 = vpop.xlane.xlu1 %1019 }
 0x41d   :  { %1586 = vpow2.f32 %v1063_v56  ;;  %v1965_v58 = vsub.f32 %v950_v23, %v1020_v57  ;;  %v1018_v59 = vpop.xlane.xlu0 %1017 }
 0x41e   :  { %1588 = vpow2.f32 %v1061_v21  ;;  %v1967_v17 = vsub.f32 %v945_v26, %v1018_v59 }
 0x41f   :  { %v1067_v60 = vmul.f32 1.442695, %v1965_v58 }
 0x420   :  { %v1065_v61 = vmul.f32 1.442695, %v1967_v17  ;;  %v1024_v62 = vpop.xlane.xlu1 %1023 }
 0x421   :  { %1590 = vpow2.f32 %v1067_v60  ;;  %v1971_v19 = vsub.f32 %v960_v27, %v1024_v62  ;;  %v1022_v63 = vpop.xlane.xlu0 %1021 }
 0x422   :  { %1592 = vpow2.f32 %v1065_v61  ;;  %v1973_v0 = vsub.f32 %v955_v31, %v1022_v63 }
 0x423   :  { %v1071_v1 = vmul.f32 1.442695, %v1971_v19 }
 0x424   :  { %v1069_v2 = vmul.f32 1.442695, %v1973_v0  ;;  %v1028_v28 = vpop.xlane.xlu1 %1027 }
 0x425   :  { %1594 = vpow2.f32 %v1071_v1  ;;  %v1977_v3 = vsub.f32 %v970_v10, %v1028_v28  ;;  %v1026_v4 = vpop.xlane.xlu0 %1025 }
 0x426   :  { %1596 = vpow2.f32 %v1069_v2  ;;  %v1979_v5 = vsub.f32 %v965_v35, %v1026_v4 }
 0x427   :  { %v1587_v6 = vpop.eup %1586  ;;  %v1075_v32 = vmul.f32 1.442695, %v1977_v3 }
 0x428   :  { %v1589_v7 = vpop.eup %1588  ;;  %v1073_v24 = vmul.f32 1.442695, %v1979_v5  ;;  %1095 = vadd.xlane.f32.xlu1 %v1587_v6  ;;  %v1032_v8 = vpop.xlane.xlu1 %1031 }
 0x429   :  { %1598 = vpow2.f32 %v1075_v32  ;;  %v1983_v11 = vsub.f32 %v980_v37, %v1032_v8  ;;  %v1030_v13 = vpop.xlane.xlu0 %1029  ;;  %1093 = vadd.xlane.f32.xlu0 %v1589_v7 }
 0x42a   :  { %1600 = vpow2.f32 %v1073_v24  ;;  %v1985_v30 = vsub.f32 %v975_v40, %v1030_v13 }
 0x42b   :  { %v1591_v15 = vpop.eup %1590  ;;  %v1079_v42 = vmul.f32 1.442695, %v1983_v11 }
 0x42c   :  { %v1593_v16 = vpop.eup %1592  ;;  %v1077_v46 = vmul.f32 1.442695, %v1985_v30  ;;  %1099 = vadd.xlane.f32.xlu1 %v1591_v15  ;;  %v1036_v20 = vpop.xlane.xlu1 %1035 }
 0x42d   :  { %1602 = vpow2.f32 %v1079_v42  ;;  %v1990_v22 = vsub.f32 %v1941_v14, %v1036_v20  ;;  %v1034_v38 = vpop.xlane.xlu0 %1033  ;;  %1097 = vadd.xlane.f32.xlu0 %v1593_v16 }
 0x42e   :  { %1604 = vpow2.f32 %v1077_v46  ;;  %v1993_v23 = vsub.f32 %v1943_v43, %v1034_v38 }
 0x42f   :  { %v1595_v25 = vpop.eup %1594  ;;  %v1083_v26 = vmul.f32 1.442695, %v1990_v22 }
 0x430   :  { %v1597_v44 = vpop.eup %1596  ;;  %v1081_v27 = vmul.f32 1.442695, %v1993_v23  ;;  %1103 = vadd.xlane.f32.xlu1 %v1595_v25  ;;  %v1040_v29 = vpop.xlane.xlu1 %1039 }
 0x431   :  { %1606 = vpow2.f32 %v1083_v26  ;;  %v1998_v31 = vsub.f32 %v1947_v47, %v1040_v29  ;;  %v1038_v33 = vpop.xlane.xlu0 %1037  ;;  %1101 = vadd.xlane.f32.xlu0 %v1597_v44 }
 0x432   :  { %1608 = vpow2.f32 %v1081_v27  ;;  %v2001_v10 = vsub.f32 %v1949_v48, %v1038_v33 }
 0x433   :  { %v1599_v34 = vpop.eup %1598  ;;  %v1087_v35 = vmul.f32 1.442695, %v1998_v31 }
 0x434   :  { %v1601_v36 = vpop.eup %1600  ;;  %v1085_v37 = vmul.f32 1.442695, %v2001_v10  ;;  %1107 = vadd.xlane.f32.xlu1 %v1599_v34  ;;  %v1044_v39 = vpop.xlane.xlu1 %1043 }
 0x435   :  { %1610 = vpow2.f32 %v1087_v35  ;;  %v2006_v40 = vsub.f32 %v1953_v50, %v1044_v39  ;;  %1105 = vadd.xlane.f32.xlu0 %v1601_v36  ;;  %v1042_v9 = vpop.xlane.xlu0 %1041 }
 0x436   :  { %1612 = vpow2.f32 %v1085_v37  ;;  %v2009_v14 = vsub.f32 %v1955_v18, %v1042_v9 }
 0x437   :  { %v1603_v41 = vpop.eup %1602  ;;  %v1091_v43 = vmul.f32 1.442695, %v2006_v40 }
 0x438   :  { %v1605_v45 = vpop.eup %1604  ;;  %v1089_v47 = vmul.f32 1.442695, %v2009_v14  ;;  %1111 = vadd.xlane.f32.xlu1 %v1603_v41 }
 0x439   :  { %1614 = vpow2.f32 %v1091_v43  ;;  %1109 = vadd.xlane.f32.xlu0 %v1605_v45 }
 0x43a   :  { %1616 = vpow2.f32 %v1089_v47 }
 0x43b   :  { %v1607_v12 = vpop.eup %1606 }
 0x43c   :  { %v1609_v48 = vpop.eup %1608  ;;  %1115 = vadd.xlane.f32.xlu1 %v1607_v12 }
 0x43d   :  { %1113 = vadd.xlane.f32.xlu0 %v1609_v48 }
 0x43f   :  { %v1611_v49 = vpop.eup %1610 }
 0x440   :  { %v1613_v50 = vpop.eup %1612  ;;  %1119 = vadd.xlane.f32.xlu1 %v1611_v49 }
 0x441   :  { %1117 = vadd.xlane.f32.xlu0 %v1613_v50 }
 0x443   :  { %v1615_v51 = vpop.eup %1614 }
 0x444   :  { %v1617_v18 = vpop.eup %1616  ;;  %1123 = vadd.xlane.f32.xlu1 %v1615_v51 }
 0x445   :  { %1121 = vadd.xlane.f32.xlu0 %v1617_v18 }
 0x4b5   :  { %v1096_v52 = vpop.xlane.xlu1 %1095 }
 0x4b6   :  { %1618 = vlog2.f32 %v1096_v52  ;;  %v1094_v54 = vpop.xlane.xlu0 %1093 }
 0x4b7   :  { %1620 = vlog2.f32 %v1094_v54 }
 0x4b9   :  { %v1100_v56 = vpop.xlane.xlu1 %1099 }
 0x4ba   :  { %1622 = vlog2.f32 %v1100_v56  ;;  %v1098_v21 = vpop.xlane.xlu0 %1097 }
 0x4bb   :  { %1624 = vlog2.f32 %v1098_v21 }
 0x4bd   :  { %v1104_v57 = vpop.xlane.xlu1 %1103 }
 0x4be   :  { %1626 = vlog2.f32 %v1104_v57  ;;  %v1102_v59 = vpop.xlane.xlu0 %1101 }
 0x4bf   :  { %1628 = vlog2.f32 %v1102_v59 }
 0x4c0   :  { %v1619_v60 = vpop.eup %1618 }
 0x4c1   :  { %v1621_v61 = vpop.eup %1620  ;;  %v1128_v62 = vmul.f32 0.6931472, %v1619_v60  ;;  %v1108_v63 = vpop.xlane.xlu1 %1107 }
 0x4c2   :  { %v1126_v1 = vmul.f32 0.6931472, %v1621_v61  ;;  %1630 = vlog2.f32 %v1108_v63  ;;  %v1106_v2 = vpop.xlane.xlu0 %1105 }
 0x4c3   :  { %v1158_v28 = vsub.f32 %v1959_v53, %v1128_v62  ;;  %1632 = vlog2.f32 %v1106_v2 }
 0x4c4   :  { %v1623_v4 = vpop.eup %1622  ;;  %v1157_v6 = vsub.f32 %v1961_v55, %v1126_v1 }
 0x4c5   :  { %v1625_v32 = vpop.eup %1624  ;;  %1174 = vst [vmem:[%s2084_s7 + $0x8] sm:$0xff] %v1158_v28  ;;  %v1132_v7 = vmul.f32 0.6931472, %v1623_v4  ;;  %v1112_v24 = vpop.xlane.xlu1 %1111 }
 0x4c6   :  { %1173 = vst [vmem:[%s2084_s7] sm:$0xff] %v1157_v6  ;;  %v1130_v8 = vmul.f32 0.6931472, %v1625_v32  ;;  %1634 = vlog2.f32 %v1112_v24  ;;  %v1110_v13 = vpop.xlane.xlu0 %1109 }
 0x4c7   :  { %v1160_v53 = vsub.f32 %v1965_v58, %v1132_v7  ;;  %1636 = vlog2.f32 %v1110_v13 }
 0x4c8   :  { %v1627_v15 = vpop.eup %1626  ;;  %v1159_v55 = vsub.f32 %v1967_v17, %v1130_v8 }
 0x4c9   :  { %v1629_v42 = vpop.eup %1628  ;;  %1176 = vst [vmem:[%s2084_s7 + $0x18] sm:$0xff] %v1160_v53  ;;  %v1136_v16 = vmul.f32 0.6931472, %v1627_v15  ;;  %v1116_v46 = vpop.xlane.xlu1 %1115 }
 0x4ca   :  { %1175 = vst [vmem:[%s2084_s7 + $0x10] sm:$0xff] %v1159_v55  ;;  %v1134_v20 = vmul.f32 0.6931472, %v1629_v42  ;;  %1638 = vlog2.f32 %v1116_v46  ;;  %v1114_v38 = vpop.xlane.xlu0 %1113 }
 0x4cb   :  { %v1162_v58 = vsub.f32 %v1971_v19, %v1136_v16  ;;  %1640 = vlog2.f32 %v1114_v38 }
 0x4cc   :  { %v1631_v25 = vpop.eup %1630  ;;  %v1161_v17 = vsub.f32 %v1973_v0, %v1134_v20 }
 0x4cd   :  { %v1633_v26 = vpop.eup %1632  ;;  %1178 = vst [vmem:[%s2084_s7 + $0x28] sm:$0xff] %v1162_v58  ;;  %v1140_v44 = vmul.f32 0.6931472, %v1631_v25  ;;  %v1120_v27 = vpop.xlane.xlu1 %1119 }
 0x4ce   :  { %1177 = vst [vmem:[%s2084_s7 + $0x20] sm:$0xff] %v1161_v17  ;;  %v1138_v29 = vmul.f32 0.6931472, %v1633_v26  ;;  %1642 = vlog2.f32 %v1120_v27  ;;  %v1118_v33 = vpop.xlane.xlu0 %1117 }
 0x4cf   :  { %v1164_v19 = vsub.f32 %v1977_v3, %v1140_v44  ;;  %1644 = vlog2.f32 %v1118_v33 }
 0x4d0   :  { %v1635_v34 = vpop.eup %1634  ;;  %v1163_v0 = vsub.f32 %v1979_v5, %v1138_v29 }
 0x4d1   :  { %v1637_v35 = vpop.eup %1636  ;;  %1180 = vst [vmem:[%s2084_s7 + $0x38] sm:$0xff] %v1164_v19  ;;  %v1144_v36 = vmul.f32 0.6931472, %v1635_v34  ;;  %v1124_v37 = vpop.xlane.xlu1 %1123 }
 0x4d2   :  { %1179 = vst [vmem:[%s2084_s7 + $0x30] sm:$0xff] %v1163_v0  ;;  %v1142_v39 = vmul.f32 0.6931472, %v1637_v35  ;;  %1646 = vlog2.f32 %v1124_v37  ;;  %v1122_v9 = vpop.xlane.xlu0 %1121 }
 0x4d3   :  { %v1166_v3 = vsub.f32 %v1983_v11, %v1144_v36  ;;  %1648 = vlog2.f32 %v1122_v9 }
 0x4d4   :  { %v1639_v41 = vpop.eup %1638  ;;  %v1165_v5 = vsub.f32 %v1985_v30, %v1142_v39 }
 0x4d5   :  { %v1641_v43 = vpop.eup %1640  ;;  %1182 = vst [vmem:[%s2084_s7 + $0x48] sm:$0xff] %v1166_v3  ;;  %v1148_v45 = vmul.f32 0.6931472, %v1639_v41 }
 0x4d6   :  { %1181 = vst [vmem:[%s2084_s7 + $0x40] sm:$0xff] %v1165_v5  ;;  %v1146_v47 = vmul.f32 0.6931472, %v1641_v43 }
 0x4d7   :  { %v1168_v12 = vsub.f32 %v1990_v22, %v1148_v45 }
 0x4d8   :  { %v1643_v48 = vpop.eup %1642  ;;  %v1167_v11 = vsub.f32 %v1993_v23, %v1146_v47 }
 0x4d9   :  { %v1645_v49 = vpop.eup %1644  ;;  %1184 = vst [vmem:[%s2084_s7 + $0x58] sm:$0xff] %v1168_v12  ;;  %v1152_v30 = vmul.f32 0.6931472, %v1643_v48 }
 0x4da   :  { %1183 = vst [vmem:[%s2084_s7 + $0x50] sm:$0xff] %v1167_v11  ;;  %v1150_v50 = vmul.f32 0.6931472, %v1645_v49 }
 0x4db   :  { %v1170_v51 = vsub.f32 %v1998_v31, %v1152_v30 }
 0x4dc   :  { %v1647_v18 = vpop.eup %1646  ;;  %v1169_v52 = vsub.f32 %v2001_v10, %v1150_v50 }
 0x4dd   :  { %v1649_v22 = vpop.eup %1648  ;;  %1186 = vst [vmem:[%s2084_s7 + $0x68] sm:$0xff] %v1170_v51  ;;  %v1156_v23 = vmul.f32 0.6931472, %v1647_v18 }
 0x4de   :  { %1185 = vst [vmem:[%s2084_s7 + $0x60] sm:$0xff] %v1169_v52  ;;  %v1154_v54 = vmul.f32 0.6931472, %v1649_v22 }
 0x4df   :  { %v1172_v56 = vsub.f32 %v2006_v40, %v1156_v23 }
 0x4e0   :  { %v1171_v21 = vsub.f32 %v2009_v14, %v1154_v54 }
 0x4e1   :  { %1188 = vst [vmem:[%s2084_s7 + $0x78] sm:$0xff] %v1172_v56 }
 0x4e2   :  { %1187 = vst [vmem:[%s2084_s7 + $0x70] sm:$0xff] %v1171_v21 }

</bundles_post_ra>
